<compile_context>
chip_gen: v7x
topology: tpu7x:2x2x1
jax: 0.10.0
libtpu: 0.0.40
codegen_flags: <defaults>
</compile_context>

<pallas_src>
import functools

import jax
import jax.numpy as jnp
from jax.experimental import pallas as pl
from jax.experimental.pallas import tpu as pltpu


def _round_up(x, m):
    return (x + m - 1) // m * m


def _l2_normalize(v, eps=1e-12):
    # Matches torch.nn.functional.normalize: v / max(||v||, eps).
    return v / jnp.maximum(jnp.linalg.norm(v), eps)


def spectral_norm_weight(weight, u):
    """nn.utils.spectral_norm training-mode forward (n_power_iterations=1)."""
    oc = weight.shape[0]
    w_mat = weight.reshape(oc, -1)
    v = _l2_normalize(w_mat.T @ u)
    u_new = _l2_normalize(w_mat @ v)
    sigma = u_new @ (w_mat @ v)
    return weight / sigma, u_new


def _conv_fused_kernel(x_ref, w_ref, b_ref, o_ref, slab_ref, *,
                       h, w, ph, pw, wp, kh, kw, c, tm, tw, num_m):
    # x_ref   : (1, C, H*W)          f32   raw (unpadded) image, spatial flat on lanes
    # w_ref   : (OC, KH*KW*C_pad)    bf16  fused per-tap weight matrix
    # b_ref   : (OC, 1)              f32   bias column
    # o_ref   : (1, OC, TM)                lane-dense output tile (padded grid, TM%128==0)
    # slab_ref: (num_m, C_pad, TW)   f32   zero-padded slab, one haloed window per MP tile
    mi = pl.program_id(1)

    # Build the zero-padded windows once per batch image (first MP tile of the
    # "arbitrary" axis).  All slice offsets below are static Python ints.
    @pl.when(mi == 0)
    def _build_padded_windows():
        slab_ref[...] = jnp.zeros_like(slab_ref)
        for r in range(h):
            a = (ph + r) * wp + pw                      # flat start of image row r
            t_lo = max(0, (a - tw) // tm + 1)
            t_hi = min(num_m - 1, (a + w - 1) // tm)
            for t in range(t_lo, t_hi + 1):             # windows overlapping this row
                lo = max(a, t * tm)
                hi = min(a + w, t * tm + tw)
                slab_ref[t, :c, lo - t * tm:hi - t * tm] = (
                    x_ref[0, :, lo - a + r * w:hi - a + r * w])

    # Window for this MP tile (dynamic index only on the major axis).
    win = slab_ref[mi]                                  # (C_pad, TW) f32

    # im2col in registers: KH*KW statically shifted (C_pad, TM) slices stacked
    # along sublanes -> one fused MXU contraction with K = KH*KW*C_pad.
    pieces = [win[:, i * wp + j:i * wp + j + tm]
              for i in range(kh) for j in range(kw)]
    stacked = jnp.concatenate(pieces, axis=0).astype(jnp.bfloat16)

    acc = jnp.dot(w_ref[...], stacked, preferred_element_type=jnp.float32)
    o_ref[0] = (acc + b_ref[...]).astype(o_ref.dtype)   # f32 bias add (negligible)


def spectral_conv2d(x, weight, bias, u, stride=(1, 1), padding=(1, 1)):
    """Forward of SpectralConv2d (zero padding).

    Returns (output NCHW, updated spectral-norm `u` vector).
    """
    n, c, h, w = x.shape
    oc, ic, kh, kw = weight.shape
    assert ic == c, "groups != 1 not supported"
    sh, sw = stride
    ph, pw = padding

    w_sn, u_new = spectral_norm_weight(weight, u)

    hp, wp = h + 2 * ph, w + 2 * pw
    oh = (hp - kh) // sh + 1
    ow = (wp - kw) // sw + 1

    rows = (oh - 1) * sh + 1                 # padded-grid rows that hold outputs
    m_needed = rows * wp

    # Lane tile: >=128 (unmasked stores), capped so there are a few MP tiles
    # per image (pipeline depth on v7x) while the per-tile stacked operand and
    # output block stay comfortably inside vregs/VMEM.
    tm = max(128, min(512, _round_up(max(m_needed // 4, 1), 128)))
    mp = _round_up(m_needed, tm)
    num_m = mp // tm

    c_pad = _round_up(c, 8)                  # f32 sublane-tile alignment for stacking
    kf = kh * kw * c_pad
    max_d = (kh - 1) * wp + (kw - 1)         # largest tap shift
    halo = _round_up(max_d, 128)
    tw = tm + halo                           # per-tile window width incl. halo
    assert tw >= tm + max_d

    # Fused weight (OC, KH*KW*C_pad): tiny host-side shuffle of the 4-D kernel.
    wt = jnp.transpose(w_sn, (0, 2, 3, 1))                    # (OC, KH, KW, C)
    wt = jnp.pad(wt, ((0, 0), (0, 0), (0, 0), (0, c_pad - c)))
    w_fused = wt.reshape(oc, kf).astype(jnp.bfloat16)
    b_col = bias.reshape(oc, 1).astype(jnp.float32)

    xf = x.reshape(n, c, h * w)              # free reshape; pad/cast happen in-kernel

    kernel = functools.partial(
        _conv_fused_kernel, h=h, w=w, ph=ph, pw=pw, wp=wp, kh=kh, kw=kw,
        c=c, tm=tm, tw=tw, num_m=num_m)

    # Rough per-step VMEM footprint (double-buffered blocks + slab scratch);
    # raise the scoped limit only when the 32 MiB default would be exceeded.
    vmem_est = (2 * c * h * w * x.dtype.itemsize + 2 * oc * kf * 2 +
                2 * oc * 4 + 2 * oc * tm * 4 + num_m * c_pad * tw * 4)
    vmem_limit = int(vmem_est * 1.5) if vmem_est * 1.5 > 32 * 2 ** 20 else None

    outp = pl.pallas_call(
        kernel,
        out_shape=jax.ShapeDtypeStruct((n, oc, mp), x.dtype),
        grid_spec=pltpu.PrefetchScalarGridSpec(
            num_scalar_prefetch=0,
            grid=(n, num_m),
            in_specs=[
                pl.BlockSpec((1, c, h * w), lambda b, m: (b, 0, 0)),   # raw image
                pl.BlockSpec((oc, kf), lambda b, m: (0, 0)),           # fused weight
                pl.BlockSpec((oc, 1), lambda b, m: (0, 0)),            # bias
            ],
            out_specs=pl.BlockSpec((1, oc, tm), lambda b, m: (b, 0, m)),
            scratch_shapes=[pltpu.VMEM((num_m, c_pad, tw), jnp.float32)],
        ),
        compiler_params=pltpu.CompilerParams(
            dimension_semantics=("parallel", "arbitrary"),
            vmem_limit_bytes=vmem_limit),
    )(xf, w_fused, b_col)

    # (N, OC, MP) -> NCHW: single slice dropping padding columns / strided rows.
    out = outp[:, :, :rows * wp].reshape(n, oc, rows, wp)
    out = out[:, :, ::sh, 0:(ow - 1) * sw + 1:sw]
    return out, u_new


if __name__ == "__main__":
    key = jax.random.PRNGKey(0)
    k_x, k_w, k_b, k_u = jax.random.split(key, 4)

    # SpectralConv2d(in_channels=4, out_channels=8, kernel_size=3, padding=1)
    N, C, H, W = 2, 4, 16, 16
    OC, KH, KW = 8, 3, 3

    x = jax.random.normal(k_x, (N, C, H, W), jnp.float32)
    weight = jax.random.normal(k_w, (OC, C, KH, KW), jnp.float32) * 0.1
    bias = jax.random.normal(k_b, (OC,), jnp.float32) * 0.1
    u = _l2_normalize(jax.random.normal(k_u, (OC,), jnp.float32))

    fwd = jax.jit(functools.partial(spectral_conv2d,
                                    stride=(1, 1), padding=(1, 1)))
    out, u_new = fwd(x, weight, bias, u)
    out = jax.block_until_ready(out)
    assert out.shape == (N, OC, H, W)

    # Reference: XLA conv with the same spectrally-normalized weight and the
    # same bf16 operand rounding the kernel uses (f32 accumulation, f32 bias).
    w_sn, _ = spectral_norm_weight(weight, u)
    xq = x.astype(jnp.bfloat16).astype(jnp.float32)
    wq = w_sn.astype(jnp.bfloat16).astype(jnp.float32)
    ref = jax.lax.conv_general_dilated(
        xq, wq, window_strides=(1, 1), padding=((1, 1), (1, 1)),
        dimension_numbers=("NCHW", "OIHW", "NCHW"),
        precision=jax.lax.Precision.HIGHEST) + bias[None, :, None, None]
    assert jnp.allclose(out, ref, atol=2e-3, rtol=2e-3), \
        float(jnp.max(jnp.abs(out - ref)))

    print("KERNEL_OK")
</pallas_src>

<mosaic_0001>
module attributes {stable_mosaic.version = 11 : i64} {
  func.func @_conv_fused_kernel(%arg0: i32, %arg1: i32, %arg2: memref<1x4x256xf32, #tpu.memory_space<vmem>>, %arg3: memref<8x72xbf16, #tpu.memory_space<vmem>>, %arg4: memref<8x1xf32, #tpu.memory_space<vmem>>, %arg5: memref<1x8x128xf32, #tpu.memory_space<vmem>>, %arg6: memref<3x8x256xf32, #tpu.memory_space<vmem>>) attributes {dimension_semantics = [#tpu.dimension_semantics<parallel>, #tpu.dimension_semantics<arbitrary>], iteration_bounds = array<i64: 2, 3>, scalar_prefetch = 0 : i64, scratch_operands = 1 : i64, tpu.core_type = #tpu.core_type<tc>, window_params = [{transform_indices = @transform_0, window_bounds = array<i64: 1, 4, 256>}, {pipeline_mode = #tpu.pipeline_mode<synchronous>, transform_indices = @transform_1, window_bounds = array<i64: 8, 72>}, {pipeline_mode = #tpu.pipeline_mode<synchronous>, transform_indices = @transform_2, window_bounds = array<i64: 8, 1>}, {transform_indices = @transform_3, window_bounds = array<i64: 1, 8, 128>}]} {
    %c0_i32 = arith.constant 0 : i32
    %0 = arith.cmpi eq, %arg1, %c0_i32 : i32
    %1 = arith.extui %0 : i1 to i32
    %c0_i32_0 = arith.constant 0 : i32
    %2 = arith.cmpi ne, %1, %c0_i32_0 : i32
    scf.if %2 {
      %cst_9 = arith.constant 0.000000e+00 : f32
      %25 = vector.broadcast %cst_9 : f32 to vector<3x8x256xf32>
      %c0_10 = arith.constant 0 : index
      %c0_11 = arith.constant 0 : index
      %c0_12 = arith.constant 0 : index
      %26 = vector.load %arg6[%c0_10, %c0_11, %c0_12] : memref<3x8x256xf32, #tpu.memory_space<vmem>>, vector<3x8x256xf32>
      tpu.vector_store %arg6[%c0_10, %c0_11, %c0_12], %25 {strides = array<i32>} : memref<3x8x256xf32, #tpu.memory_space<vmem>>, vector<3x8x256xf32>,
      %c0_13 = arith.constant 0 : index
      %c0_14 = arith.constant 0 : index
      %c0_15 = arith.constant 0 : index
      %27 = vector.load %arg2[%c0_13, %c0_14, %c0_15] : memref<1x4x256xf32, #tpu.memory_space<vmem>>, vector<1x4x16xf32>
      %28 = vector.shape_cast %27 : vector<1x4x16xf32> to vector<4x16xf32>
      %c0_16 = arith.constant 0 : index
      %c0_17 = arith.constant 0 : index
      %c19 = arith.constant 19 : index
      %29 = vector.load %arg6[%c0_16, %c0_17, %c19] : memref<3x8x256xf32, #tpu.memory_space<vmem>>, vector<1x4x16xf32>
      %30 = vector.shape_cast %29 : vector<1x4x16xf32> to vector<4x16xf32>
      %31 = vector.shape_cast %28 : vector<4x16xf32> to vector<1x4x16xf32>
      tpu.vector_store %arg6[%c0_16, %c0_17, %c19], %31 {strides = array<i32>} : memref<3x8x256xf32, #tpu.memory_space<vmem>>, vector<1x4x16xf32>,
      %c0_18 = arith.constant 0 : index
      %c0_19 = arith.constant 0 : index
      %c16 = arith.constant 16 : index
      %32 = vector.load %arg2[%c0_18, %c0_19, %c16] : memref<1x4x256xf32, #tpu.memory_space<vmem>>, vector<1x4x16xf32>
      %33 = vector.shape_cast %32 : vector<1x4x16xf32> to vector<4x16xf32>
      %c0_20 = arith.constant 0 : index
      %c0_21 = arith.constant 0 : index
      %c37 = arith.constant 37 : index
      %34 = vector.load %arg6[%c0_20, %c0_21, %c37] : memref<3x8x256xf32, #tpu.memory_space<vmem>>, vector<1x4x16xf32>
      %35 = vector.shape_cast %34 : vector<1x4x16xf32> to vector<4x16xf32>
      %36 = vector.shape_cast %33 : vector<4x16xf32> to vector<1x4x16xf32>
      tpu.vector_store %arg6[%c0_20, %c0_21, %c37], %36 {strides = array<i32>} : memref<3x8x256xf32, #tpu.memory_space<vmem>>, vector<1x4x16xf32>,
      %c0_22 = arith.constant 0 : index
      %c0_23 = arith.constant 0 : index
      %c32 = arith.constant 32 : index
      %37 = vector.load %arg2[%c0_22, %c0_23, %c32] : memref<1x4x256xf32, #tpu.memory_space<vmem>>, vector<1x4x16xf32>
      %38 = vector.shape_cast %37 : vector<1x4x16xf32> to vector<4x16xf32>
      %c0_24 = arith.constant 0 : index
      %c0_25 = arith.constant 0 : index
      %c55 = arith.constant 55 : index
      %39 = vector.load %arg6[%c0_24, %c0_25, %c55] : memref<3x8x256xf32, #tpu.memory_space<vmem>>, vector<1x4x16xf32>
      %40 = vector.shape_cast %39 : vector<1x4x16xf32> to vector<4x16xf32>
      %41 = vector.shape_cast %38 : vector<4x16xf32> to vector<1x4x16xf32>
      tpu.vector_store %arg6[%c0_24, %c0_25, %c55], %41 {strides = array<i32>} : memref<3x8x256xf32, #tpu.memory_space<vmem>>, vector<1x4x16xf32>,
      %c0_26 = arith.constant 0 : index
      %c0_27 = arith.constant 0 : index
      %c48 = arith.constant 48 : index
      %42 = vector.load %arg2[%c0_26, %c0_27, %c48] : memref<1x4x256xf32, #tpu.memory_space<vmem>>, vector<1x4x16xf32>
      %43 = vector.shape_cast %42 : vector<1x4x16xf32> to vector<4x16xf32>
      %c0_28 = arith.constant 0 : index
      %c0_29 = arith.constant 0 : index
      %c73 = arith.constant 73 : index
      %44 = vector.load %arg6[%c0_28, %c0_29, %c73] : memref<3x8x256xf32, #tpu.memory_space<vmem>>, vector<1x4x16xf32>
      %45 = vector.shape_cast %44 : vector<1x4x16xf32> to vector<4x16xf32>
      %46 = vector.shape_cast %43 : vector<4x16xf32> to vector<1x4x16xf32>
      tpu.vector_store %arg6[%c0_28, %c0_29, %c73], %46 {strides = array<i32>} : memref<3x8x256xf32, #tpu.memory_space<vmem>>, vector<1x4x16xf32>,
      %c0_30 = arith.constant 0 : index
      %c0_31 = arith.constant 0 : index
      %c64 = arith.constant 64 : index
      %47 = vector.load %arg2[%c0_30, %c0_31, %c64] : memref<1x4x256xf32, #tpu.memory_space<vmem>>, vector<1x4x16xf32>
      %48 = vector.shape_cast %47 : vector<1x4x16xf32> to vector<4x16xf32>
      %c0_32 = arith.constant 0 : index
      %c0_33 = arith.constant 0 : index
      %c91 = arith.constant 91 : index
      %49 = vector.load %arg6[%c0_32, %c0_33, %c91] : memref<3x8x256xf32, #tpu.memory_space<vmem>>, vector<1x4x16xf32>
      %50 = vector.shape_cast %49 : vector<1x4x16xf32> to vector<4x16xf32>
      %51 = vector.shape_cast %48 : vector<4x16xf32> to vector<1x4x16xf32>
      tpu.vector_store %arg6[%c0_32, %c0_33, %c91], %51 {strides = array<i32>} : memref<3x8x256xf32, #tpu.memory_space<vmem>>, vector<1x4x16xf32>,
      %c0_34 = arith.constant 0 : index
      %c0_35 = arith.constant 0 : index
      %c80 = arith.constant 80 : index
      %52 = vector.load %arg2[%c0_34, %c0_35, %c80] : memref<1x4x256xf32, #tpu.memory_space<vmem>>, vector<1x4x16xf32>
      %53 = vector.shape_cast %52 : vector<1x4x16xf32> to vector<4x16xf32>
      %c0_36 = arith.constant 0 : index
      %c0_37 = arith.constant 0 : index
      %c109 = arith.constant 109 : index
      %54 = vector.load %arg6[%c0_36, %c0_37, %c109] : memref<3x8x256xf32, #tpu.memory_space<vmem>>, vector<1x4x16xf32>
      %55 = vector.shape_cast %54 : vector<1x4x16xf32> to vector<4x16xf32>
      %56 = vector.shape_cast %53 : vector<4x16xf32> to vector<1x4x16xf32>
      tpu.vector_store %arg6[%c0_36, %c0_37, %c109], %56 {strides = array<i32>} : memref<3x8x256xf32, #tpu.memory_space<vmem>>, vector<1x4x16xf32>,
      %c0_38 = arith.constant 0 : index
      %c0_39 = arith.constant 0 : index
      %c96 = arith.constant 96 : index
      %57 = vector.load %arg2[%c0_38, %c0_39, %c96] : memref<1x4x256xf32, #tpu.memory_space<vmem>>, vector<1x4x16xf32>
      %58 = vector.shape_cast %57 : vector<1x4x16xf32> to vector<4x16xf32>
      %c0_40 = arith.constant 0 : index
      %c0_41 = arith.constant 0 : index
      %c127 = arith.constant 127 : index
      %59 = vector.load %arg6[%c0_40, %c0_41, %c127] : memref<3x8x256xf32, #tpu.memory_space<vmem>>, vector<1x4x16xf32>
      %60 = vector.shape_cast %59 : vector<1x4x16xf32> to vector<4x16xf32>
      %61 = vector.shape_cast %58 : vector<4x16xf32> to vector<1x4x16xf32>
      tpu.vector_store %arg6[%c0_40, %c0_41, %c127], %61 {strides = array<i32>} : memref<3x8x256xf32, #tpu.memory_space<vmem>>, vector<1x4x16xf32>,
      %c0_42 = arith.constant 0 : index
      %c0_43 = arith.constant 0 : index
      %c97 = arith.constant 97 : index
      %62 = vector.load %arg2[%c0_42, %c0_43, %c97] : memref<1x4x256xf32, #tpu.memory_space<vmem>>, vector<1x4x15xf32>
      %63 = vector.shape_cast %62 : vector<1x4x15xf32> to vector<4x15xf32>
      %c1 = arith.constant 1 : index
      %c0_44 = arith.constant 0 : index
      %c0_45 = arith.constant 0 : index
      %64 = vector.load %arg6[%c1, %c0_44, %c0_45] : memref<3x8x256xf32, #tpu.memory_space<vmem>>, vector<1x4x15xf32>
      %65 = vector.shape_cast %64 : vector<1x4x15xf32> to vector<4x15xf32>
      %66 = vector.shape_cast %63 : vector<4x15xf32> to vector<1x4x15xf32>
      tpu.vector_store %arg6[%c1, %c0_44, %c0_45], %66 {strides = array<i32>} : memref<3x8x256xf32, #tpu.memory_space<vmem>>, vector<1x4x15xf32>,
      %c0_46 = arith.constant 0 : index
      %c0_47 = arith.constant 0 : index
      %c112 = arith.constant 112 : index
      %67 = vector.load %arg2[%c0_46, %c0_47, %c112] : memref<1x4x256xf32, #tpu.memory_space<vmem>>, vector<1x4x16xf32>
      %68 = vector.shape_cast %67 : vector<1x4x16xf32> to vector<4x16xf32>
      %c0_48 = arith.constant 0 : index
      %c0_49 = arith.constant 0 : index
      %c145 = arith.constant 145 : index
      %69 = vector.load %arg6[%c0_48, %c0_49, %c145] : memref<3x8x256xf32, #tpu.memory_space<vmem>>, vector<1x4x16xf32>
      %70 = vector.shape_cast %69 : vector<1x4x16xf32> to vector<4x16xf32>
      %71 = vector.shape_cast %68 : vector<4x16xf32> to vector<1x4x16xf32>
      tpu.vector_store %arg6[%c0_48, %c0_49, %c145], %71 {strides = array<i32>} : memref<3x8x256xf32, #tpu.memory_space<vmem>>, vector<1x4x16xf32>,
      %c0_50 = arith.constant 0 : index
      %c0_51 = arith.constant 0 : index
      %c112_52 = arith.constant 112 : index
      %72 = vector.load %arg2[%c0_50, %c0_51, %c112_52] : memref<1x4x256xf32, #tpu.memory_space<vmem>>, vector<1x4x16xf32>
      %73 = vector.shape_cast %72 : vector<1x4x16xf32> to vector<4x16xf32>
      %c1_53 = arith.constant 1 : index
      %c0_54 = arith.constant 0 : index
      %c17 = arith.constant 17 : index
      %74 = vector.load %arg6[%c1_53, %c0_54, %c17] : memref<3x8x256xf32, #tpu.memory_space<vmem>>, vector<1x4x16xf32>
      %75 = vector.shape_cast %74 : vector<1x4x16xf32> to vector<4x16xf32>
      %76 = vector.shape_cast %73 : vector<4x16xf32> to vector<1x4x16xf32>
      tpu.vector_store %arg6[%c1_53, %c0_54, %c17], %76 {strides = array<i32>} : memref<3x8x256xf32, #tpu.memory_space<vmem>>, vector<1x4x16xf32>,
      %c0_55 = arith.constant 0 : index
      %c0_56 = arith.constant 0 : index
      %c128 = arith.constant 128 : index
      %77 = vector.load %arg2[%c0_55, %c0_56, %c128] : memref<1x4x256xf32, #tpu.memory_space<vmem>>, vector<1x4x16xf32>
      %78 = vector.shape_cast %77 : vector<1x4x16xf32> to vector<4x16xf32>
      %c0_57 = arith.constant 0 : index
      %c0_58 = arith.constant 0 : index
      %c163 = arith.constant 163 : index
      %79 = vector.load %arg6[%c0_57, %c0_58, %c163] : memref<3x8x256xf32, #tpu.memory_space<vmem>>, vector<1x4x16xf32>
      %80 = vector.shape_cast %79 : vector<1x4x16xf32> to vector<4x16xf32>
      %81 = vector.shape_cast %78 : vector<4x16xf32> to vector<1x4x16xf32>
      tpu.vector_store %arg6[%c0_57, %c0_58, %c163], %81 {strides = array<i32>} : memref<3x8x256xf32, #tpu.memory_space<vmem>>, vector<1x4x16xf32>,
      %c0_59 = arith.constant 0 : index
      %c0_60 = arith.constant 0 : index
      %c128_61 = arith.constant 128 : index
      %82 = vector.load %arg2[%c0_59, %c0_60, %c128_61] : memref<1x4x256xf32, #tpu.memory_space<vmem>>, vector<1x4x16xf32>
      %83 = vector.shape_cast %82 : vector<1x4x16xf32> to vector<4x16xf32>
      %c1_62 = arith.constant 1 : index
      %c0_63 = arith.constant 0 : index
      %c35 = arith.constant 35 : index
      %84 = vector.load %arg6[%c1_62, %c0_63, %c35] : memref<3x8x256xf32, #tpu.memory_space<vmem>>, vector<1x4x16xf32>
      %85 = vector.shape_cast %84 : vector<1x4x16xf32> to vector<4x16xf32>
      %86 = vector.shape_cast %83 : vector<4x16xf32> to vector<1x4x16xf32>
      tpu.vector_store %arg6[%c1_62, %c0_63, %c35], %86 {strides = array<i32>} : memref<3x8x256xf32, #tpu.memory_space<vmem>>, vector<1x4x16xf32>,
      %c0_64 = arith.constant 0 : index
      %c0_65 = arith.constant 0 : index
      %c144 = arith.constant 144 : index
      %87 = vector.load %arg2[%c0_64, %c0_65, %c144] : memref<1x4x256xf32, #tpu.memory_space<vmem>>, vector<1x4x16xf32>
      %88 = vector.shape_cast %87 : vector<1x4x16xf32> to vector<4x16xf32>
      %c0_66 = arith.constant 0 : index
      %c0_67 = arith.constant 0 : index
      %c181 = arith.constant 181 : index
      %89 = vector.load %arg6[%c0_66, %c0_67, %c181] : memref<3x8x256xf32, #tpu.memory_space<vmem>>, vector<1x4x16xf32>
      %90 = vector.shape_cast %89 : vector<1x4x16xf32> to vector<4x16xf32>
      %91 = vector.shape_cast %88 : vector<4x16xf32> to vector<1x4x16xf32>
      tpu.vector_store %arg6[%c0_66, %c0_67, %c181], %91 {strides = array<i32>} : memref<3x8x256xf32, #tpu.memory_space<vmem>>, vector<1x4x16xf32>,
      %c0_68 = arith.constant 0 : index
      %c0_69 = arith.constant 0 : index
      %c144_70 = arith.constant 144 : index
      %92 = vector.load %arg2[%c0_68, %c0_69, %c144_70] : memref<1x4x256xf32, #tpu.memory_space<vmem>>, vector<1x4x16xf32>
      %93 = vector.shape_cast %92 : vector<1x4x16xf32> to vector<4x16xf32>
      %c1_71 = arith.constant 1 : index
      %c0_72 = arith.constant 0 : index
      %c53 = arith.constant 53 : index
      %94 = vector.load %arg6[%c1_71, %c0_72, %c53] : memref<3x8x256xf32, #tpu.memory_space<vmem>>, vector<1x4x16xf32>
      %95 = vector.shape_cast %94 : vector<1x4x16xf32> to vector<4x16xf32>
      %96 = vector.shape_cast %93 : vector<4x16xf32> to vector<1x4x16xf32>
      tpu.vector_store %arg6[%c1_71, %c0_72, %c53], %96 {strides = array<i32>} : memref<3x8x256xf32, #tpu.memory_space<vmem>>, vector<1x4x16xf32>,
      %c0_73 = arith.constant 0 : index
      %c0_74 = arith.constant 0 : index
      %c160 = arith.constant 160 : index
      %97 = vector.load %arg2[%c0_73, %c0_74, %c160] : memref<1x4x256xf32, #tpu.memory_space<vmem>>, vector<1x4x16xf32>
      %98 = vector.shape_cast %97 : vector<1x4x16xf32> to vector<4x16xf32>
      %c0_75 = arith.constant 0 : index
      %c0_76 = arith.constant 0 : index
      %c199 = arith.constant 199 : index
      %99 = vector.load %arg6[%c0_75, %c0_76, %c199] : memref<3x8x256xf32, #tpu.memory_space<vmem>>, vector<1x4x16xf32>
      %100 = vector.shape_cast %99 : vector<1x4x16xf32> to vector<4x16xf32>
      %101 = vector.shape_cast %98 : vector<4x16xf32> to vector<1x4x16xf32>
      tpu.vector_store %arg6[%c0_75, %c0_76, %c199], %101 {strides = array<i32>} : memref<3x8x256xf32, #tpu.memory_space<vmem>>, vector<1x4x16xf32>,
      %c0_77 = arith.constant 0 : index
      %c0_78 = arith.constant 0 : index
      %c160_79 = arith.constant 160 : index
      %102 = vector.load %arg2[%c0_77, %c0_78, %c160_79] : memref<1x4x256xf32, #tpu.memory_space<vmem>>, vector<1x4x16xf32>
      %103 = vector.shape_cast %102 : vector<1x4x16xf32> to vector<4x16xf32>
      %c1_80 = arith.constant 1 : index
      %c0_81 = arith.constant 0 : index
      %c71 = arith.constant 71 : index
      %104 = vector.load %arg6[%c1_80, %c0_81, %c71] : memref<3x8x256xf32, #tpu.memory_space<vmem>>, vector<1x4x16xf32>
      %105 = vector.shape_cast %104 : vector<1x4x16xf32> to vector<4x16xf32>
      %106 = vector.shape_cast %103 : vector<4x16xf32> to vector<1x4x16xf32>
      tpu.vector_store %arg6[%c1_80, %c0_81, %c71], %106 {strides = array<i32>} : memref<3x8x256xf32, #tpu.memory_space<vmem>>, vector<1x4x16xf32>,
      %c0_82 = arith.constant 0 : index
      %c0_83 = arith.constant 0 : index
      %c176 = arith.constant 176 : index
      %107 = vector.load %arg2[%c0_82, %c0_83, %c176] : memref<1x4x256xf32, #tpu.memory_space<vmem>>, vector<1x4x16xf32>
      %108 = vector.shape_cast %107 : vector<1x4x16xf32> to vector<4x16xf32>
      %c0_84 = arith.constant 0 : index
      %c0_85 = arith.constant 0 : index
      %c217 = arith.constant 217 : index
      %109 = vector.load %arg6[%c0_84, %c0_85, %c217] : memref<3x8x256xf32, #tpu.memory_space<vmem>>, vector<1x4x16xf32>
      %110 = vector.shape_cast %109 : vector<1x4x16xf32> to vector<4x16xf32>
      %111 = vector.shape_cast %108 : vector<4x16xf32> to vector<1x4x16xf32>
      tpu.vector_store %arg6[%c0_84, %c0_85, %c217], %111 {strides = array<i32>} : memref<3x8x256xf32, #tpu.memory_space<vmem>>, vector<1x4x16xf32>,
      %c0_86 = arith.constant 0 : index
      %c0_87 = arith.constant 0 : index
      %c176_88 = arith.constant 176 : index
      %112 = vector.load %arg2[%c0_86, %c0_87, %c176_88] : memref<1x4x256xf32, #tpu.memory_space<vmem>>, vector<1x4x16xf32>
      %113 = vector.shape_cast %112 : vector<1x4x16xf32> to vector<4x16xf32>
      %c1_89 = arith.constant 1 : index
      %c0_90 = arith.constant 0 : index
      %c89 = arith.constant 89 : index
      %114 = vector.load %arg6[%c1_89, %c0_90, %c89] : memref<3x8x256xf32, #tpu.memory_space<vmem>>, vector<1x4x16xf32>
      %115 = vector.shape_cast %114 : vector<1x4x16xf32> to vector<4x16xf32>
      %116 = vector.shape_cast %113 : vector<4x16xf32> to vector<1x4x16xf32>
      tpu.vector_store %arg6[%c1_89, %c0_90, %c89], %116 {strides = array<i32>} : memref<3x8x256xf32, #tpu.memory_space<vmem>>, vector<1x4x16xf32>,
      %c0_91 = arith.constant 0 : index
      %c0_92 = arith.constant 0 : index
      %c192 = arith.constant 192 : index
      %117 = vector.load %arg2[%c0_91, %c0_92, %c192] : memref<1x4x256xf32, #tpu.memory_space<vmem>>, vector<1x4x16xf32>
      %118 = vector.shape_cast %117 : vector<1x4x16xf32> to vector<4x16xf32>
      %c0_93 = arith.constant 0 : index
      %c0_94 = arith.constant 0 : index
      %c235 = arith.constant 235 : index
      %119 = vector.load %arg6[%c0_93, %c0_94, %c235] : memref<3x8x256xf32, #tpu.memory_space<vmem>>, vector<1x4x16xf32>
      %120 = vector.shape_cast %119 : vector<1x4x16xf32> to vector<4x16xf32>
      %121 = vector.shape_cast %118 : vector<4x16xf32> to vector<1x4x16xf32>
      tpu.vector_store %arg6[%c0_93, %c0_94, %c235], %121 {strides = array<i32>} : memref<3x8x256xf32, #tpu.memory_space<vmem>>, vector<1x4x16xf32>,
      %c0_95 = arith.constant 0 : index
      %c0_96 = arith.constant 0 : index
      %c192_97 = arith.constant 192 : index
      %122 = vector.load %arg2[%c0_95, %c0_96, %c192_97] : memref<1x4x256xf32, #tpu.memory_space<vmem>>, vector<1x4x16xf32>
      %123 = vector.shape_cast %122 : vector<1x4x16xf32> to vector<4x16xf32>
      %c1_98 = arith.constant 1 : index
      %c0_99 = arith.constant 0 : index
      %c107 = arith.constant 107 : index
      %124 = vector.load %arg6[%c1_98, %c0_99, %c107] : memref<3x8x256xf32, #tpu.memory_space<vmem>>, vector<1x4x16xf32>
      %125 = vector.shape_cast %124 : vector<1x4x16xf32> to vector<4x16xf32>
      %126 = vector.shape_cast %123 : vector<4x16xf32> to vector<1x4x16xf32>
      tpu.vector_store %arg6[%c1_98, %c0_99, %c107], %126 {strides = array<i32>} : memref<3x8x256xf32, #tpu.memory_space<vmem>>, vector<1x4x16xf32>,
      %c0_100 = arith.constant 0 : index
      %c0_101 = arith.constant 0 : index
      %c208 = arith.constant 208 : index
      %127 = vector.load %arg2[%c0_100, %c0_101, %c208] : memref<1x4x256xf32, #tpu.memory_space<vmem>>, vector<1x4x3xf32>
      %128 = vector.shape_cast %127 : vector<1x4x3xf32> to vector<4x3xf32>
      %c0_102 = arith.constant 0 : index
      %c0_103 = arith.constant 0 : index
      %c253 = arith.constant 253 : index
      %129 = vector.load %arg6[%c0_102, %c0_103, %c253] : memref<3x8x256xf32, #tpu.memory_space<vmem>>, vector<1x4x3xf32>
      %130 = vector.shape_cast %129 : vector<1x4x3xf32> to vector<4x3xf32>
      %131 = vector.shape_cast %128 : vector<4x3xf32> to vector<1x4x3xf32>
      tpu.vector_store %arg6[%c0_102, %c0_103, %c253], %131 {strides = array<i32>} : memref<3x8x256xf32, #tpu.memory_space<vmem>>, vector<1x4x3xf32>,
      %c0_104 = arith.constant 0 : index
      %c0_105 = arith.constant 0 : index
      %c208_106 = arith.constant 208 : index
      %132 = vector.load %arg2[%c0_104, %c0_105, %c208_106] : memref<1x4x256xf32, #tpu.memory_space<vmem>>, vector<1x4x16xf32>
      %133 = vector.shape_cast %132 : vector<1x4x16xf32> to vector<4x16xf32>
      %c1_107 = arith.constant 1 : index
      %c0_108 = arith.constant 0 : index
      %c125 = arith.constant 125 : index
      %134 = vector.load %arg6[%c1_107, %c0_108, %c125] : memref<3x8x256xf32, #tpu.memory_space<vmem>>, vector<1x4x16xf32>
      %135 = vector.shape_cast %134 : vector<1x4x16xf32> to vector<4x16xf32>
      %136 = vector.shape_cast %133 : vector<4x16xf32> to vector<1x4x16xf32>
      tpu.vector_store %arg6[%c1_107, %c0_108, %c125], %136 {strides = array<i32>} : memref<3x8x256xf32, #tpu.memory_space<vmem>>, vector<1x4x16xf32>,
      %c0_109 = arith.constant 0 : index
      %c0_110 = arith.constant 0 : index
      %c211 = arith.constant 211 : index
      %137 = vector.load %arg2[%c0_109, %c0_110, %c211] : memref<1x4x256xf32, #tpu.memory_space<vmem>>, vector<1x4x13xf32>
      %138 = vector.shape_cast %137 : vector<1x4x13xf32> to vector<4x13xf32>
      %c2 = arith.constant 2 : index
      %c0_111 = arith.constant 0 : index
      %c0_112 = arith.constant 0 : index
      %139 = vector.load %arg6[%c2, %c0_111, %c0_112] : memref<3x8x256xf32, #tpu.memory_space<vmem>>, vector<1x4x13xf32>
      %140 = vector.shape_cast %139 : vector<1x4x13xf32> to vector<4x13xf32>
      %141 = vector.shape_cast %138 : vector<4x13xf32> to vector<1x4x13xf32>
      tpu.vector_store %arg6[%c2, %c0_111, %c0_112], %141 {strides = array<i32>} : memref<3x8x256xf32, #tpu.memory_space<vmem>>, vector<1x4x13xf32>,
      %c0_113 = arith.constant 0 : index
      %c0_114 = arith.constant 0 : index
      %c224 = arith.constant 224 : index
      %142 = vector.load %arg2[%c0_113, %c0_114, %c224] : memref<1x4x256xf32, #tpu.memory_space<vmem>>, vector<1x4x16xf32>
      %143 = vector.shape_cast %142 : vector<1x4x16xf32> to vector<4x16xf32>
      %c1_115 = arith.constant 1 : index
      %c0_116 = arith.constant 0 : index
      %c143 = arith.constant 143 : index
      %144 = vector.load %arg6[%c1_115, %c0_116, %c143] : memref<3x8x256xf32, #tpu.memory_space<vmem>>, vector<1x4x16xf32>
      %145 = vector.shape_cast %144 : vector<1x4x16xf32> to vector<4x16xf32>
      %146 = vector.shape_cast %143 : vector<4x16xf32> to vector<1x4x16xf32>
      tpu.vector_store %arg6[%c1_115, %c0_116, %c143], %146 {strides = array<i32>} : memref<3x8x256xf32, #tpu.memory_space<vmem>>, vector<1x4x16xf32>,
      %c0_117 = arith.constant 0 : index
      %c0_118 = arith.constant 0 : index
      %c224_119 = arith.constant 224 : index
      %147 = vector.load %arg2[%c0_117, %c0_118, %c224_119] : memref<1x4x256xf32, #tpu.memory_space<vmem>>, vector<1x4x16xf32>
      %148 = vector.shape_cast %147 : vector<1x4x16xf32> to vector<4x16xf32>
      %c2_120 = arith.constant 2 : index
      %c0_121 = arith.constant 0 : index
      %c15 = arith.constant 15 : index
      %149 = vector.load %arg6[%c2_120, %c0_121, %c15] : memref<3x8x256xf32, #tpu.memory_space<vmem>>, vector<1x4x16xf32>
      %150 = vector.shape_cast %149 : vector<1x4x16xf32> to vector<4x16xf32>
      %151 = vector.shape_cast %148 : vector<4x16xf32> to vector<1x4x16xf32>
      tpu.vector_store %arg6[%c2_120, %c0_121, %c15], %151 {strides = array<i32>} : memref<3x8x256xf32, #tpu.memory_space<vmem>>, vector<1x4x16xf32>,
      %c0_122 = arith.constant 0 : index
      %c0_123 = arith.constant 0 : index
      %c240 = arith.constant 240 : index
      %152 = vector.load %arg2[%c0_122, %c0_123, %c240] : memref<1x4x256xf32, #tpu.memory_space<vmem>>, vector<1x4x16xf32>
      %153 = vector.shape_cast %152 : vector<1x4x16xf32> to vector<4x16xf32>
      %c1_124 = arith.constant 1 : index
      %c0_125 = arith.constant 0 : index
      %c161 = arith.constant 161 : index
      %154 = vector.load %arg6[%c1_124, %c0_125, %c161] : memref<3x8x256xf32, #tpu.memory_space<vmem>>, vector<1x4x16xf32>
      %155 = vector.shape_cast %154 : vector<1x4x16xf32> to vector<4x16xf32>
      %156 = vector.shape_cast %153 : vector<4x16xf32> to vector<1x4x16xf32>
      tpu.vector_store %arg6[%c1_124, %c0_125, %c161], %156 {strides = array<i32>} : memref<3x8x256xf32, #tpu.memory_space<vmem>>, vector<1x4x16xf32>,
      %c0_126 = arith.constant 0 : index
      %c0_127 = arith.constant 0 : index
      %c240_128 = arith.constant 240 : index
      %157 = vector.load %arg2[%c0_126, %c0_127, %c240_128] : memref<1x4x256xf32, #tpu.memory_space<vmem>>, vector<1x4x16xf32>
      %158 = vector.shape_cast %157 : vector<1x4x16xf32> to vector<4x16xf32>
      %c2_129 = arith.constant 2 : index
      %c0_130 = arith.constant 0 : index
      %c33 = arith.constant 33 : index
      %159 = vector.load %arg6[%c2_129, %c0_130, %c33] : memref<3x8x256xf32, #tpu.memory_space<vmem>>, vector<1x4x16xf32>
      %160 = vector.shape_cast %159 : vector<1x4x16xf32> to vector<4x16xf32>
      %161 = vector.shape_cast %158 : vector<4x16xf32> to vector<1x4x16xf32>
      tpu.vector_store %arg6[%c2_129, %c0_130, %c33], %161 {strides = array<i32>} : memref<3x8x256xf32, #tpu.memory_space<vmem>>, vector<1x4x16xf32>,
    } else {
    }
    %3 = arith.index_cast %arg1 : i32 to index
    %c0 = arith.constant 0 : index
    %c0_1 = arith.constant 0 : index
    %4 = vector.load %arg6[%3, %c0, %c0_1] : memref<3x8x256xf32, #tpu.memory_space<vmem>>, vector<1x8x256xf32>
    %5 = vector.shape_cast %4 : vector<1x8x256xf32> to vector<8x256xf32>
    %6 = vector.extract_strided_slice %5 {offsets = [0, 0], sizes = [8, 128], strides = [1, 1]} : vector<8x256xf32> to vector<8x128xf32>
    %7 = vector.extract_strided_slice %5 {offsets = [0, 1], sizes = [8, 128], strides = [1, 1]} : vector<8x256xf32> to vector<8x128xf32>
    %8 = vector.extract_strided_slice %5 {offsets = [0, 2], sizes = [8, 128], strides = [1, 1]} : vector<8x256xf32> to vector<8x128xf32>
    %9 = vector.extract_strided_slice %5 {offsets = [0, 18], sizes = [8, 128], strides = [1, 1]} : vector<8x256xf32> to vector<8x128xf32>
    %10 = vector.extract_strided_slice %5 {offsets = [0, 19], sizes = [8, 128], strides = [1, 1]} : vector<8x256xf32> to vector<8x128xf32>
    %11 = vector.extract_strided_slice %5 {offsets = [0, 20], sizes = [8, 128], strides = [1, 1]} : vector<8x256xf32> to vector<8x128xf32>
    %12 = vector.extract_strided_slice %5 {offsets = [0, 36], sizes = [8, 128], strides = [1, 1]} : vector<8x256xf32> to vector<8x128xf32>
    %13 = vector.extract_strided_slice %5 {offsets = [0, 37], sizes = [8, 128], strides = [1, 1]} : vector<8x256xf32> to vector<8x128xf32>
    %14 = vector.extract_strided_slice %5 {offsets = [0, 38], sizes = [8, 128], strides = [1, 1]} : vector<8x256xf32> to vector<8x128xf32>
    %15 = tpu.concatenate %6, %7, %8, %9, %10, %11, %12, %13, %14 in 0 : vector<8x128xf32>, vector<8x128xf32>, vector<8x128xf32>, vector<8x128xf32>, vector<8x128xf32>, vector<8x128xf32>, vector<8x128xf32>, vector<8x128xf32>, vector<8x128xf32> -> vector<72x128xf32>
    %16 = arith.truncf %15 : vector<72x128xf32> to vector<72x128xbf16>
    %c0_2 = arith.constant 0 : index
    %c0_3 = arith.constant 0 : index
    %17 = vector.load %arg3[%c0_2, %c0_3] : memref<8x72xbf16, #tpu.memory_space<vmem>>, vector<8x72xbf16>
    %cst = arith.constant dense<0.000000e+00> : vector<8x128xf32>
    %18 = tpu.matmul %17, %16, %cst {dimension_numbers = #tpu.dot_dimension_numbers<[1], [0], [0], [1], [0, 0, 1, 1], [], []>} : vector<8x72xbf16>, vector<72x128xbf16>, vector<8x128xf32> -> vector<8x128xf32>
    %c0_4 = arith.constant 0 : index
    %c0_5 = arith.constant 0 : index
    %19 = vector.load %arg4[%c0_4, %c0_5] : memref<8x1xf32, #tpu.memory_space<vmem>>, vector<8x1xf32>
    %20 = vector.broadcast %19 : vector<8x1xf32> to vector<8x128xf32>
    %21 = arith.addf %18, %20 : vector<8x128xf32>
    %c0_6 = arith.constant 0 : index
    %c0_7 = arith.constant 0 : index
    %c0_8 = arith.constant 0 : index
    %22 = vector.load %arg5[%c0_6, %c0_7, %c0_8] : memref<1x8x128xf32, #tpu.memory_space<vmem>>, vector<1x8x128xf32>
    %23 = vector.shape_cast %22 : vector<1x8x128xf32> to vector<8x128xf32>
    %24 = vector.shape_cast %21 : vector<8x128xf32> to vector<1x8x128xf32>
    tpu.vector_store %arg5[%c0_6, %c0_7, %c0_8], %24 {strides = array<i32>} : memref<1x8x128xf32, #tpu.memory_space<vmem>>, vector<1x8x128xf32>,
    return
  }
  func.func @transform_0(%arg0: i32, %arg1: i32) -> (i32, i32, i32) {
    %c0_i32 = arith.constant 0 : i32
    %c0_i32_0 = arith.constant 0 : i32
    %c0_i32_1 = arith.constant 0 : i32
    return %arg0, %c0_i32, %c0_i32_0 : i32, i32, i32
  }
  func.func @transform_1(%arg0: i32, %arg1: i32) -> (i32, i32) {
    %c0_i32 = arith.constant 0 : i32
    %c0_i32_0 = arith.constant 0 : i32
    %c0_i32_1 = arith.constant 0 : i32
    return %c0_i32, %c0_i32_0 : i32, i32
  }
  func.func @transform_2(%arg0: i32, %arg1: i32) -> (i32, i32) {
    %c0_i32 = arith.constant 0 : i32
    %c0_i32_0 = arith.constant 0 : i32
    %c0_i32_1 = arith.constant 0 : i32
    return %c0_i32, %c0_i32_0 : i32, i32
  }
  func.func @transform_3(%arg0: i32, %arg1: i32) -> (i32, i32, i32) {
    %c0_i32 = arith.constant 0 : i32
    %c0_i32_0 = arith.constant 0 : i32
    return %arg0, %c0_i32, %arg1 : i32, i32, i32
  }
}

</mosaic_0001>

<bundles_post_ra>
// kernel: spectral_conv2d.1
= control target key start
LH: loop header
LB: loop body
LE: loop exit
PB: predicated region body
PF: predicated region fallthrough
CT: control target
= control target key end

     0   :  { %s826_s12 = smov 0   ;;  %s828_s13 = smov 0   ;;  %s927_s0 = inlined_call_operand.vmem [shape: f32[2,4,256], index: 0, kind: input, shape index: {}]   ;;  %s928_s1 = inlined_call_operand.vmem [shape: bf16[8,72], index: 1, kind: input, shape index: {}]   ;;  %s929_s2 = inlined_call_operand.vmem [shape: f32[8,1], index: 2, kind: input, shape index: {}]   ;;  %s930_s3 = inlined_call_operand.vmem [shape: f32[2,8,384], index: 3, kind: output, shape index: {}]  }
   0x1   :  { %s830_s14 = smov 0   ;;  %s832_s15 = smov 0  }
   0x2   :  { %s834_s16 = smov 0  }
   0x3 LB: > { %s22_s17 = sadd.s32 1, %s768_s14  ;;  %s25_s18 = sadd.s32 1, %s772_s15  ;;  %s776_s16 = sphi %s834_s16, %s13_s16   ;;  %s772_s15 = sphi %s832_s15, %s934_s15   ;;  %s768_s14 = sphi %s830_s14, %s933_s14   ;;  %s764_s13 = sphi %s828_s13, %s932_s13   ;;  %s760_s12 = sphi %s826_s12, %s931_s12  }
   0x4   : > { %p23_p0 = scmp.ge.s32.totalorder %s22_s17, 3  ;;  %p596_p1 = scmp.ge.s32.totalorder %s776_s16, 1 }
   0x5   : > { %p151_p2 = scmp.lt.s32.totalorder %s776_s16, 7 }
   0x6   : > { %s936_s17 = smov (%p23_p0, %s22_s17), 0  ;;  %s938_s18 = smov (!%p23_p0, %s25_s18), %s772_s15 }
   0x7   : > { %p152_p3 = pnand %p596_p1, %p151_p2  ;;  %p27_p4 = scmp.ge.s32.totalorder %s938_s18, 2 }
   0x8   : > { %p178_p5 = scmp.lt.s32.totalorder (!%p152_p3), %s764_s13, 1  ;;  %p185_p6 = scmp.lt.s32.totalorder (!%p152_p3), %s760_s12, 2 }
   0x9   : > { %s940_s18 = smov (%p27_p4, %s938_s18), 0  ;;  %155 = sbr.rel (%p152_p3) target bundleno = 552 (0x228), region = 32 }
   0xa   : > { %p600_p7 = scmp.ne.s32.totalorder (!%p152_p3), %s760_s12, 0 }
  0x10   : > { %s942_s13 = smov (!%p178_p5, %s764_s13), 1  ;;  %195 = sbr.rel (%p600_p7) target bundleno = 189 (0xbd), region = 36 }
  0x11   : > { %s186_s19 = scalar_select %p185_p6, %s760_s12, 2 }
  0x12   : > { %s606_s20 = sshll.u32 %s942_s13, 3  ;;  %s628_s21 = smul.u32 3, %s942_s13  ;;  %v782_v8 = vmov (!%p600_p7), 0.0   ;;  %vm251_vm0 = vcmask (!%p600_p7), 117760   ;;  %vm207_vm1 = vcmask (!%p600_p7), 281752   ;;  %vm265_vm2 = vcmask (!%p600_p7), 265352  }
  0x13   : > { %s863_s24 = scalar_lea.vmem %s927_s0, %s606_s20  ;;  %s778_s30 = smov (!%p600_p7), 31   ;;  %197 = vst [vmem:[#allocation2 + $0x8] sm:$0xff] (!%p600_p7), %v782_v8  ;;  %201 = vst [vmem:[#allocation2 + $0x28] sm:$0xff] (!%p600_p7), %v782_v8  ;;  %vm214_vm3 = vcmask (!%p600_p7), 429352   ;;  %vm278_vm4 = vcmask (!%p600_p7), 412952   ;;  %vm221_vm5 = vcmask (!%p600_p7), 576952  }
  0x14   : > { %s188_s25 = sadd.s32 %s628_s21, %s186_s19  ;;  %v244_v0 = vld [vmem:[%s863_s24] sm:$0xf] (!%p600_p7)  ;;  %s779_s4 = smov (!%p600_p7), 19   ;;  %v273_v6 = vld [vmem:[%s863_s24 + $0x4] sm:$0xf] (!%p600_p7)  ;;  %196 = vst [vmem:[#allocation2] sm:$0xff] (!%p600_p7), %v782_v8 }
  0x15   : > { %s599_s26 = sshll.u32 %s188_s25, 3  ;;  %v202_v1 = vld [vmem:[%s863_s24] sm:$0xf] (!%p600_p7)  ;;  %246 = vrot.lane.b32.xlu0 (!%p600_p7), %v244_v0, %s778_s30  ;;  %s780_s5 = smov (!%p600_p7), 33   ;;  %v280_v7 = vld [vmem:[%s863_s24 + $0x4] sm:$0xf] (!%p600_p7) }
  0x16   : > { %s868_s29 = scalar_lea.vmem %s930_s3, %s599_s26  ;;  %204 = vrot.lane.b32.xlu1 (!%p600_p7), %v202_v1, %s779_s4  ;;  %v253_v2 = vld [vmem:[%s863_s24] sm:$0xf] (!%p600_p7)  ;;  %s781_s6 = smov (!%p600_p7), 21   ;;  %198 = vst [vmem:[#allocation2 + $0x10] sm:$0xff] (!%p600_p7), %v782_v8  ;;  %199 = vst [vmem:[#allocation2 + $0x18] sm:$0xff] (!%p600_p7), %v782_v8  ;;  %vm291_vm6 = vcmask (!%p600_p7), 560552  }
  0x17   : > { %v260_v3 = vld [vmem:[%s863_s24] sm:$0xf]  ;;  %200 = vst [vmem:[#allocation2 + $0x20] sm:$0xff] %v782_v8  ;;  %s783_s7 = smov 35   ;;  %v286_v10 = vld [vmem:[%s863_s24 + $0x4] sm:$0xf] }
  0x18   : > { %v267_v4 = vld [vmem:[%s863_s24] sm:$0xf]  ;;  %s784_s8 = smov 23   ;;  %s785_s9 = smov 37   ;;  %v293_v11 = vld [vmem:[%s863_s24 + $0x4] sm:$0xf] }
  0x19   : > { %255 = vrot.lane.b32.xlu0 %v253_v2, %s778_s30  ;;  %v209_v5 = vld [vmem:[%s863_s24] sm:$0xf]  ;;  %s786_s10 = smov 25   ;;  %v299_v13 = vld [vmem:[%s863_s24 + $0x4] sm:$0xf]  ;;  %s787_s11 = smov 39  }
  0x1a   : > { %262 = vrot.lane.b32.xlu1 %v260_v3, %s780_s5  ;;  %v216_v9 = vld [vmem:[%s863_s24] sm:$0xf]  ;;  %v306_v14 = vld [vmem:[%s863_s24 + $0x4] sm:$0xf]  ;;  %s788_s13 = smov 27   ;;  %s789_s19 = smov 41  }
  0x1b   : > { %v223_v12 = vld [vmem:[%s863_s24] sm:$0xf]  ;;  %v312_v16 = vld [vmem:[%s863_s24 + $0x4] sm:$0xf]  ;;  %s790_s20 = smov 45   ;;  %s791_s21 = smov 29  }
  0x1c   : > { %v230_v15 = vld [vmem:[%s863_s24] sm:$0xf]  ;;  %v319_v17 = vld [vmem:[%s863_s24 + $0x4] sm:$0xf]  ;;  %s792_s22 = smov 43   ;;  %s793_s23 = smov 47  }
  0x1d   : > { %269 = vrot.lane.b32.xlu0 %v267_v4, %s780_s5  ;;  %v345_v18 = vld [vmem:[%s863_s24 + $0x4] sm:$0xf]  ;;  %v237_v20 = vld [vmem:[%s863_s24] sm:$0xf]  ;;  %s794_s25 = smov 49   ;;  %vm228_vm7 = vcmask 724552  }
  0x1e   : > { %211 = vrot.lane.b32.xlu1 %v209_v5, %s781_s6  ;;  %v353_v19 = vld [vmem:[%s863_s24 + $0x4] sm:$0xf]  ;;  %vm304_vm8 = vcmask 708152   ;;  %vm235_vm9 = vcmask 872152   ;;  %vm317_vm10 = vcmask 855752   ;;  %vm351_vm11 = vcmask 101376  }
  0x1f   : > { %v325_v21 = vld [vmem:[%s863_s24 + $0x4] sm:$0xf]  ;;  %vm242_vm12 = vcmask 1019752   ;;  %vm249_vm13 = vcmask 1044472   ;;  %vm330_vm14 = vcmask 1003352   ;;  %vm343_vm15 = vcmask 1044456  }
  0x20   : > { %v332_v22 = vld [vmem:[%s863_s24 + $0x4] sm:$0xf] }
  0x21   : > { %275 = vrot.lane.b32.xlu0 %v273_v6, %s783_s7  ;;  %v360_v23 = vld [vmem:[%s863_s24 + $0x4] sm:$0xf] }
  0x22   : > { %282 = vrot.lane.b32.xlu1 %v280_v7, %s783_s7  ;;  %v367_v24 = vld [vmem:[%s863_s24 + $0x4] sm:$0xf] }
  0x23   : > { %v338_v25 = vld [vmem:[%s863_s24 + $0x4] sm:$0xf] }
  0x24   : > { %v373_v26 = vld [vmem:[%s863_s24 + $0x4] sm:$0xf] }
  0x25   : > { %218 = vrot.lane.b32.xlu0 %v216_v9, %s784_s8  ;;  %v380_v27 = vld [vmem:[%s863_s24 + $0x4] sm:$0xf] }
  0x26   : > { %288 = vrot.lane.b32.xlu1 %v286_v10, %s785_s9 }
  0x29   : > { %295 = vrot.lane.b32.xlu0 %v293_v11, %s785_s9 }
  0x2a   : > { %225 = vrot.lane.b32.xlu1 %v223_v12, %s786_s10 }
  0x2d   : > { %301 = vrot.lane.b32.xlu0 %v299_v13, %s787_s11 }
  0x2e   : > { %308 = vrot.lane.b32.xlu1 %v306_v14, %s787_s11 }
  0x31   : > { %232 = vrot.lane.b32.xlu0 %v230_v15, %s788_s13 }
  0x32   : > { %314 = vrot.lane.b32.xlu1 %v312_v16, %s789_s19 }
  0x35   : > { %321 = vrot.lane.b32.xlu0 %v319_v17, %s789_s19 }
  0x36   : > { %347 = vrot.lane.b32.xlu1 %v345_v18, %s790_s20 }
  0x39   : > { %355 = vrot.lane.b32.xlu0 %v353_v19, %s790_s20 }
  0x3a   : > { %239 = vrot.lane.b32.xlu1 %v237_v20, %s791_s21 }
  0x3d   : > { %327 = vrot.lane.b32.xlu0 %v325_v21, %s792_s22 }
  0x3e   : > { %334 = vrot.lane.b32.xlu1 %v332_v22, %s792_s22 }
  0x41   : > { %362 = vrot.lane.b32.xlu0 %v360_v23, %s793_s23 }
  0x42   : > { %369 = vrot.lane.b32.xlu1 %v367_v24, %s793_s23 }
  0x45   : > { %340 = vrot.lane.b32.xlu0 %v338_v25, %s790_s20 }
  0x46   : > { %375 = vrot.lane.b32.xlu1 %v373_v26, %s794_s25 }
  0x49   : > { %382 = vrot.lane.b32.xlu0 %v380_v27, %s794_s25 }
  0x87   : > { %v247_v28 = vpop.permute.xlu0 %246 }
  0x88   : > { %v205_v29 = vpop.permute.xlu1 %204  ;;  %252 = vst.msk [vmem:[#allocation2 + $0x8] sm:$0xf] %vm251_vm0, %v247_v28 }
  0x89   : > { %208 = vst.msk [vmem:[#allocation2] sm:$0xf] %vm207_vm1, %v205_v29  ;;  %vm378_vm1 = vcmask 396552  }
  0x8b   : > { %v256_v30 = vpop.permute.xlu0 %255 }
  0x8c   : > { %v263_v31 = vpop.permute.xlu1 %262  ;;  %259 = vst.msk [vmem:[#allocation2 + $0x10] sm:$0xf] %vm251_vm0, %v256_v30  ;;  %vm365_vm0 = vcmask 248952  }
  0x8d   : > { %266 = vst.msk [vmem:[#allocation2 + $0x8] sm:$0xf] %vm265_vm2, %v263_v31 }
  0x8f   : > { %v270_v32 = vpop.permute.xlu0 %269 }
  0x90   : > { %v212_v33 = vpop.permute.xlu1 %211  ;;  %272 = vst.msk [vmem:[#allocation2 + $0x10] sm:$0xf] %vm265_vm2, %v270_v32 }
  0x91   : > { %215 = vst.msk [vmem:[#allocation2] sm:$0xf] %vm214_vm3, %v212_v33 }
  0x93   : > { %v276_v34 = vpop.permute.xlu0 %275 }
  0x94   : > { %v283_v35 = vpop.permute.xlu1 %282  ;;  %279 = vst.msk [vmem:[#allocation2 + $0x8] sm:$0xf] %vm278_vm4, %v276_v34 }
  0x95   : > { %285 = vst.msk [vmem:[#allocation2 + $0x10] sm:$0xf] %vm278_vm4, %v283_v35 }
  0x97   : > { %v219_v36 = vpop.permute.xlu0 %218 }
  0x98   : > { %v289_v37 = vpop.permute.xlu1 %288  ;;  %222 = vst.msk [vmem:[#allocation2] sm:$0xf] %vm221_vm5, %v219_v36 }
  0x99   : > { %292 = vst.msk [vmem:[#allocation2 + $0x8] sm:$0xf] %vm291_vm6, %v289_v37 }
  0x9b   : > { %v296_v38 = vpop.permute.xlu0 %295 }
  0x9c   : > { %v226_v39 = vpop.permute.xlu1 %225  ;;  %298 = vst.msk [vmem:[#allocation2 + $0x10] sm:$0xf] %vm291_vm6, %v296_v38 }
  0x9d   : > { %229 = vst.msk [vmem:[#allocation2] sm:$0xf] %vm228_vm7, %v226_v39 }
  0x9f   : > { %v302_v40 = vpop.permute.xlu0 %301 }
  0xa0   : > { %v309_v41 = vpop.permute.xlu1 %308  ;;  %305 = vst.msk [vmem:[#allocation2 + $0x8] sm:$0xf] %vm304_vm8, %v302_v40 }
  0xa1   : > { %311 = vst.msk [vmem:[#allocation2 + $0x10] sm:$0xf] %vm304_vm8, %v309_v41 }
  0xa3   : > { %v233_v42 = vpop.permute.xlu0 %232 }
  0xa4   : > { %v315_v43 = vpop.permute.xlu1 %314  ;;  %236 = vst.msk [vmem:[#allocation2] sm:$0xf] %vm235_vm9, %v233_v42 }
  0xa5   : > { %318 = vst.msk [vmem:[#allocation2 + $0x8] sm:$0xf] %vm317_vm10, %v315_v43 }
  0xa7   : > { %v322_v44 = vpop.permute.xlu0 %321 }
  0xa8   : > { %v348_v45 = vpop.permute.xlu1 %347  ;;  %324 = vst.msk [vmem:[#allocation2 + $0x10] sm:$0xf] %vm317_vm10, %v322_v44 }
  0xa9   : > { %352 = vst.msk [vmem:[#allocation2 + $0x18] sm:$0xf] %vm351_vm11, %v348_v45 }
  0xab   : > { %v356_v46 = vpop.permute.xlu0 %355 }
  0xac   : > { %v240_v47 = vpop.permute.xlu1 %239  ;;  %359 = vst.msk [vmem:[#allocation2 + $0x20] sm:$0xf] %vm351_vm11, %v356_v46 }
  0xad   : > { %243 = vst.msk [vmem:[#allocation2] sm:$0xf] %vm242_vm12, %v240_v47 }
  0xae   : > { %250 = vst.msk [vmem:[#allocation2] sm:$0xf] %vm249_vm13, %v247_v28 }
  0xaf   : > { %v328_v48 = vpop.permute.xlu0 %327 }
  0xb0   : > { %v335_v49 = vpop.permute.xlu1 %334  ;;  %331 = vst.msk [vmem:[#allocation2 + $0x8] sm:$0xf] %vm330_vm14, %v328_v48 }
  0xb1   : > { %337 = vst.msk [vmem:[#allocation2 + $0x10] sm:$0xf] %vm330_vm14, %v335_v49 }
  0xb2   : > { %350 = vst.msk [vmem:[#allocation2 + $0x10] sm:$0xf] %vm343_vm15, %v348_v45 }
  0xb3   : > { %v363_v50 = vpop.permute.xlu0 %362 }
  0xb4   : > { %v370_v51 = vpop.permute.xlu1 %369  ;;  %366 = vst.msk [vmem:[#allocation2 + $0x18] sm:$0xf] %vm365_vm0, %v363_v50 }
  0xb5   : > { %372 = vst.msk [vmem:[#allocation2 + $0x20] sm:$0xf] %vm365_vm0, %v370_v51 }
  0xb7   : > { %v341_v52 = vpop.permute.xlu0 %340 }
  0xb8   : > { %v376_v53 = vpop.permute.xlu1 %375  ;;  %344 = vst.msk [vmem:[#allocation2 + $0x8] sm:$0xf] %vm343_vm15, %v341_v52 }
  0xb9   : > { %379 = vst.msk [vmem:[#allocation2 + $0x18] sm:$0xf] %vm378_vm1, %v376_v53 }
  0xbb   : > { %v383_v54 = vpop.permute.xlu0 %382 }
  0xbc   : > { %385 = vst.msk [vmem:[#allocation2 + $0x20] sm:$0xf] %vm378_vm1, %v383_v54 }
  0xbd PF: > { %s607_s24 = sshll.u32 %s760_s12, 4  ;;  %v795_v55 = vmov 0.0   ;;  %s796_s27 = smov 127   ;;  %vm802_vm2 = vmmov 0   ;;  %v805_v59 = vmov 0   ;;  %v455_v60 = vld [vmem:[%s929_s2] sm:$0xff] }
  0xbe   : > { %614 = vmatprep.subr.bf16.mxu0 %v795_v55  ;;  %s388_s26 = scalar_lea.vmem [#allocation2], %s607_s24  ;;  %s797_s28 = smov 110   ;;  %624 = vmatprep.mubr.msk.bf16.mxu0 %vm802_vm2, %v795_v55  ;;  %vm397_vm3 = vcmask 1039360   ;;  %vm411_vm4 = vcmask 900096   ;;  %vm404_vm5 = vcmask 1031168   ;;  %vm418_vm6 = vcmask 891904  }
  0xbf   : > { %s798_s30 = smov 126   ;;  %s799_s4 = smov 109   ;;  %737 = vset.pattern.permute.xlu0 %v805_v59  ;;  %vm425_vm7 = vcmask 883712   ;;  %vm432_vm8 = vcmask 752640   ;;  %vm439_vm9 = vcmask 744448   ;;  %vm446_vm10 = vcmask 736256  }
  0xc0   : > { %s800_s5 = smov 108   ;;  %s801_s6 = smov 92   ;;  %vm465_vm11 = vcmask 1043456   ;;  %v454_v35 = vld [vmem:[%s928_s1] sm:$0xf]  ;;  %vm461_vm12 = vcmask 588800  }
  0xc1   : > { %s803_s12 = smov 91   ;;  %s804_s7 = smov 90  }
  0xc3   : > { %v389_v56 = vld [vmem:[%s388_s26] sm:$0xff]  ;;  %v390_v57 = vld [vmem:[%s388_s26 + $0x8] sm:$0xff] }
  0xc4   : > { %v697_v58 = vpack.i.bf16 %v390_v57, %v389_v56 }
  0xc6   : > { %698 = vrot.lane.b32.xlu0 %v697_v58, %s796_s27  ;;  %708 = vrot.lane.b32.xlu1 %v697_v58, %s797_s28 }
  0xca   : > { %703 = vrot.lane.b32.xlu0 %v697_v58, %s798_s30  ;;  %713 = vrot.lane.b32.xlu1 %v697_v58, %s799_s4 }
  0xce   : > { %718 = vrot.lane.b32.xlu0 %v697_v58, %s800_s5  ;;  %723 = vrot.lane.b32.xlu1 %v697_v58, %s801_s6 }
  0xd2   : > { %728 = vrot.lane.b32.xlu0 %v697_v58, %s803_s12  ;;  %733 = vrot.lane.b32.xlu1 %v697_v58, %s804_s7 }
  0xd6   : > { %458 = vperm.xlu0 %737, %v455_v60  }
 0x138   : > { %v699_v61 = vpop.permute.xlu0 %698  ;;  %v709_v62 = vpop.permute.xlu1 %708 }
 0x139   : > { %v701_v63 = vunpack.i.h.bf16 %v699_v61  ;;  %v700_v0 = vunpack.i.l.bf16 %v699_v61  ;;  %v711_v1 = vunpack.i.h.bf16 %v709_v62  ;;  %v710_v2 = vunpack.i.l.bf16 %v709_v62 }
 0x13b   : > { %v398_v3 = vsel %vm397_vm3, %v700_v0, %v701_v63  ;;  %v412_v7 = vsel %vm411_vm4, %v710_v2, %v711_v1 }
 0x13c   : > { %v704_v4 = vpop.permute.xlu0 %703  ;;  %v449_v5 = vpack.c.bf16 %v398_v3, %v389_v56  ;;  %v714_v6 = vpop.permute.xlu1 %713 }
 0x13d   : > { %v706_v8 = vunpack.i.h.bf16 %v704_v4  ;;  %v705_v9 = vunpack.i.l.bf16 %v704_v4  ;;  %v716_v10 = vunpack.i.h.bf16 %v714_v6  ;;  %v715_v11 = vunpack.i.l.bf16 %v714_v6 }
 0x13e   : > { %615 = vmatpush3.bf16.msra.mxu0 %v449_v5 }
 0x13f   : > { %616 = vmatprep.subr.bf16.mxu0 %v795_v55  ;;  %v405_v12 = vsel %vm404_vm5, %v705_v9, %v706_v8  ;;  %v419_v16 = vsel %vm418_vm6, %v715_v11, %v716_v10 }
 0x140   : > { %v719_v13 = vpop.permute.xlu0 %718  ;;  %v450_v14 = vpack.c.bf16 %v412_v7, %v405_v12  ;;  %v724_v15 = vpop.permute.xlu1 %723 }
 0x141   : > { %v721_v17 = vunpack.i.h.bf16 %v719_v13  ;;  %v720_v18 = vunpack.i.l.bf16 %v719_v13  ;;  %v726_v19 = vunpack.i.h.bf16 %v724_v15  ;;  %v725_v20 = vunpack.i.l.bf16 %v724_v15 }
 0x142   : > { %617 = vmatpush3.bf16.msra.mxu0 %v450_v14 }
 0x143   : > { %618 = vmatprep.subr.bf16.mxu0 %v795_v55  ;;  %v426_v21 = vsel %vm425_vm7, %v720_v18, %v721_v17  ;;  %v433_v25 = vsel %vm432_vm8, %v725_v20, %v726_v19 }
 0x144   : > { %v729_v22 = vpop.permute.xlu0 %728  ;;  %v451_v23 = vpack.c.bf16 %v426_v21, %v419_v16  ;;  %v734_v24 = vpop.permute.xlu1 %733 }
 0x145   : > { %v731_v26 = vunpack.i.h.bf16 %v729_v22  ;;  %v730_v27 = vunpack.i.l.bf16 %v729_v22  ;;  %v736_v28 = vunpack.i.h.bf16 %v734_v24  ;;  %v735_v29 = vunpack.i.l.bf16 %v734_v24 }
 0x146   : > { %619 = vmatpush3.bf16.msra.mxu0 %v451_v23 }
 0x147   : > { %620 = vmatprep.subr.bf16.mxu0 %v795_v55  ;;  %v440_v30 = vsel %vm439_vm9, %v730_v27, %v731_v26  ;;  %v447_v31 = vsel %vm446_vm10, %v735_v29, %v736_v28 }
 0x148   : > { %v452_v32 = vpack.c.bf16 %v440_v30, %v433_v25  ;;  %v453_v33 = vpack.c.bf16 %v447_v31, %v447_v31 }
 0x14a   : > { %621 = vmatpush3.bf16.msra.mxu0 %v452_v32  ;;  %v467_v34 = vsel %vm465_vm11, %v453_v33, 0 }
 0x14b   : > { %622 = vmatprep.subr.bf16.mxu0 %v795_v55 }
 0x14e   : > { %623 = vmatpush3.bf16.msra.mxu0 %v467_v34 }
 0x151   : > { %625 = vmatmul.mubr.msk.bf16.vlgmr.msra.gmra.mrb[0].mxu0 %vm461_vm12, %v454_v35 }
 0x155   : > { %v459_v36 = vpop.permute.xlu0 %458 }
 0x224   : > { %v503_v37 = vpop.f32.mrb[0].mxu0 }
 0x225   : > { %v504_v38 = vadd.f32 %v503_v37, %v459_v36  ;;  %v626_v39 = vpop.f32.mrb[1].mxu0 }
 0x226   : > { %v506_v40 = vpop.f32.mrb[2].mxu0 }
 0x227   : > { %509 = vst [vmem:[%s868_s29] sm:$0xff] %v504_v38  ;;  %v627_v41 = vpop.f32.mrb[3].mxu0 }
 0x228 PF: > { %s13_s16 = sadd.s32 1, %s776_s16   ;;  %s931_s12 = smov %s768_s14 }
 0x229   : > { %p10_p8 = scmp.ge.s32.totalorder %s13_s16, 8   ;;  %s932_s13 = smov %s772_s15 }
 0x22a   : > { %s933_s14 = smov %s936_s17  ;;  %s934_s15 = smov %s940_s18 }
 0x22b   :  { %12 = sbr.rel (!%p10_p8) target bundleno = 3 (0x3), region = 69 }

</bundles_post_ra>
